<compile_context>
chip_gen: v6e
topology: v6e:2x2x1
jax: 0.10.0
libtpu: 0.0.40
codegen_flags: <defaults>
</compile_context>

<pallas_src>
import jax
import jax.numpy as jnp
from jax import lax
from jax.experimental import pallas as pl
from jax.experimental.pallas import tpu as pltpu

BN_EPS = 1e-5  # PyTorch nn.BatchNorm1d default


def _fclenet_kernel(x_ref, w1_ref, b1_ref, gamma_ref, beta_ref, w2_ref, b2_ref,
                    out_ref):
    """Fused: Linear(49->c) -> BatchNorm1d(c, training batch stats) -> ReLU -> Linear(c->nc)."""
    x = x_ref[...]                                            # (B, 49)  f32

    # ---- Linear 1: (B, 49) @ (49, c) + b1 ------------------------------- MXU
    h = jnp.dot(x, w1_ref[...], preferred_element_type=jnp.float32)
    h = h + b1_ref[...]                                       # (B, c), b1 is (1, c)

    # ---- BatchNorm1d (training mode: biased batch statistics) ----------- VPU/XLU
    mean = jnp.mean(h, axis=0, keepdims=True)                 # (1, c)
    var = jnp.mean((h - mean) * (h - mean), axis=0, keepdims=True)
    inv_std = lax.rsqrt(var + BN_EPS)                         # EUP
    h = (h - mean) * inv_std * gamma_ref[...] + beta_ref[...]

    # ---- ReLU ------------------------------------------------------------
    h = jnp.maximum(h, 0.0)

    # ---- Linear 2: (B, c) @ (c, nc) + b2 --------------------------------- MXU
    out = jnp.dot(h, w2_ref[...], preferred_element_type=jnp.float32)
    out = out + b2_ref[...]                                   # (B, nc)

    out_ref[...] = out.astype(out_ref.dtype)


def fclenet_forward(x, params):
    """Equivalent of PyTorch fclenet.forward(x) (freshly-constructed module, train mode BN)."""
    w1, b1, gamma, beta, w2, b2 = (
        params["w1"], params["b1"], params["gamma"],
        params["beta"], params["w2"], params["b2"],
    )
    in_f, c = w1.shape
    _, nc = w2.shape

    total = x.size
    assert total % in_f == 0, f"cannot view {x.shape} as (-1, {in_f})"
    n_rows = total // in_f

    # View(49): pure metadata reshape (matches torch contiguous .view()).
    x2d = jnp.reshape(x, (n_rows, in_f)).astype(jnp.float32)

    # Whole problem fits comfortably in VMEM -> single fused invocation.
    # (BatchNorm batch statistics need the full batch in one block anyway.)
    out = pl.pallas_call(
        _fclenet_kernel,
        out_shape=jax.ShapeDtypeStruct((n_rows, nc), jnp.float32),
        grid_spec=pltpu.PrefetchScalarGridSpec(
            num_scalar_prefetch=0,
            grid=(1,),
            in_specs=[
                pl.BlockSpec((n_rows, in_f), lambda i: (0, 0)),  # x
                pl.BlockSpec((in_f, c),      lambda i: (0, 0)),  # w1
                pl.BlockSpec((1, c),         lambda i: (0, 0)),  # b1
                pl.BlockSpec((1, c),         lambda i: (0, 0)),  # gamma
                pl.BlockSpec((1, c),         lambda i: (0, 0)),  # beta
                pl.BlockSpec((c, nc),        lambda i: (0, 0)),  # w2
                pl.BlockSpec((1, nc),        lambda i: (0, 0)),  # b2
            ],
            out_specs=pl.BlockSpec((n_rows, nc), lambda i: (0, 0)),
        ),
        compiler_params=pltpu.CompilerParams(
            dimension_semantics=("arbitrary",),
        ),
    )(x2d, w1, b1, gamma, beta, w2, b2)
    return out


def _reference_forward(x, params):
    """Pure-JAX reference (mirrors the PyTorch module in default train mode)."""
    w1, b1, gamma, beta, w2, b2 = (
        params["w1"], params["b1"], params["gamma"],
        params["beta"], params["w2"], params["b2"],
    )
    in_f = w1.shape[0]
    x2d = jnp.reshape(x, (-1, in_f)).astype(jnp.float32)
    h = x2d @ w1 + b1
    mean = jnp.mean(h, axis=0, keepdims=True)
    var = jnp.mean((h - mean) ** 2, axis=0, keepdims=True)
    h = (h - mean) / jnp.sqrt(var + BN_EPS) * gamma + beta
    h = jnp.maximum(h, 0.0)
    return h @ w2 + b2


def init_params(key, in_f=49, c=64, nc=10):
    k1, k2, k3, k4 = jax.random.split(key, 4)
    s1 = 1.0 / jnp.sqrt(in_f)
    s2 = 1.0 / jnp.sqrt(c)
    return {
        "w1": jax.random.uniform(k1, (in_f, c), jnp.float32, -s1, s1),
        "b1": jax.random.uniform(k2, (1, c), jnp.float32, -s1, s1),
        "gamma": jnp.ones((1, c), jnp.float32),   # fresh BatchNorm1d: weight = 1
        "beta": jnp.zeros((1, c), jnp.float32),   # fresh BatchNorm1d: bias = 0
        "w2": jax.random.uniform(k3, (c, nc), jnp.float32, -s2, s2),
        "b2": jax.random.uniform(k4, (1, nc), jnp.float32, -s2, s2),
    }


if __name__ == "__main__":
    key = jax.random.PRNGKey(0)
    kx, kp = jax.random.split(key)

    # "halfmnist"-style input: (batch=2, channels=1, 14, 14) -> View(49) -> (8, 49)
    x = jax.random.normal(kx, (2, 1, 14, 14), dtype=jnp.float32)
    params = init_params(kp, in_f=49, c=64, nc=10)

    y = fclenet_forward(x, params)
    y = jax.block_until_ready(y)

    ref = _reference_forward(x, params)
    assert y.shape == ref.shape, (y.shape, ref.shape)
    assert y.dtype == ref.dtype
    assert bool(jnp.allclose(y, ref, rtol=1e-4, atol=1e-4)), float(
        jnp.max(jnp.abs(y - ref)))

    print("KERNEL_OK")
</pallas_src>

<mosaic_0001>
module attributes {stable_mosaic.version = 11 : i64} {
  func.func @_fclenet_kernel(%arg0: i32, %arg1: memref<8x49xf32, #tpu.memory_space<vmem>>, %arg2: memref<49x64xf32, #tpu.memory_space<vmem>>, %arg3: memref<1x64xf32, #tpu.memory_space<vmem>>, %arg4: memref<1x64xf32, #tpu.memory_space<vmem>>, %arg5: memref<1x64xf32, #tpu.memory_space<vmem>>, %arg6: memref<64x10xf32, #tpu.memory_space<vmem>>, %arg7: memref<1x10xf32, #tpu.memory_space<vmem>>, %arg8: memref<8x10xf32, #tpu.memory_space<vmem>>) attributes {dimension_semantics = [#tpu.dimension_semantics<arbitrary>], iteration_bounds = array<i64: 1>, scalar_prefetch = 0 : i64, scratch_operands = 0 : i64, tpu.core_type = #tpu.core_type<tc>, window_params = [{pipeline_mode = #tpu.pipeline_mode<synchronous>, transform_indices = @transform_0, window_bounds = array<i64: 8, 49>}, {pipeline_mode = #tpu.pipeline_mode<synchronous>, transform_indices = @transform_1, window_bounds = array<i64: 49, 64>}, {pipeline_mode = #tpu.pipeline_mode<synchronous>, transform_indices = @transform_2, window_bounds = array<i64: 1, 64>}, {pipeline_mode = #tpu.pipeline_mode<synchronous>, transform_indices = @transform_3, window_bounds = array<i64: 1, 64>}, {pipeline_mode = #tpu.pipeline_mode<synchronous>, transform_indices = @transform_4, window_bounds = array<i64: 1, 64>}, {pipeline_mode = #tpu.pipeline_mode<synchronous>, transform_indices = @transform_5, window_bounds = array<i64: 64, 10>}, {pipeline_mode = #tpu.pipeline_mode<synchronous>, transform_indices = @transform_6, window_bounds = array<i64: 1, 10>}, {pipeline_mode = #tpu.pipeline_mode<synchronous>, transform_indices = @transform_7, window_bounds = array<i64: 8, 10>}]} {
    %c0 = arith.constant 0 : index
    %c0_0 = arith.constant 0 : index
    %0 = vector.load %arg1[%c0, %c0_0] : memref<8x49xf32, #tpu.memory_space<vmem>>, vector<8x49xf32>
    %c0_1 = arith.constant 0 : index
    %c0_2 = arith.constant 0 : index
    %1 = vector.load %arg2[%c0_1, %c0_2] : memref<49x64xf32, #tpu.memory_space<vmem>>, vector<49x64xf32>
    %cst = arith.constant dense<0.000000e+00> : vector<8x64xf32>
    %2 = tpu.matmul %0, %1, %cst {dimension_numbers = #tpu.dot_dimension_numbers<[1], [0], [0], [1], [0, 0, 1, 1], [], []>} : vector<8x49xf32>, vector<49x64xf32>, vector<8x64xf32> -> vector<8x64xf32>
    %c0_3 = arith.constant 0 : index
    %c0_4 = arith.constant 0 : index
    %3 = vector.load %arg3[%c0_3, %c0_4] : memref<1x64xf32, #tpu.memory_space<vmem>>, vector<1x64xf32>
    %4 = vector.broadcast %3 : vector<1x64xf32> to vector<8x64xf32>
    %5 = arith.addf %2, %4 : vector<8x64xf32>
    %cst_5 = arith.constant dense<0.000000e+00> : vector<64xf32>
    %6 = vector.multi_reduction <add>, %5, %cst_5 [0] : vector<8x64xf32> to vector<64xf32>
    %7 = vector.shape_cast %6 : vector<64xf32> to vector<1x64xf32>
    %cst_6 = arith.constant 8.000000e+00 : f32
    %8 = vector.broadcast %cst_6 : f32 to vector<1x64xf32>
    %9 = arith.divf %7, %8 : vector<1x64xf32>
    %10 = vector.broadcast %9 : vector<1x64xf32> to vector<8x64xf32>
    %11 = arith.subf %5, %10 : vector<8x64xf32>
    %12 = vector.broadcast %9 : vector<1x64xf32> to vector<8x64xf32>
    %13 = arith.subf %5, %12 : vector<8x64xf32>
    %14 = arith.mulf %11, %13 : vector<8x64xf32>
    %cst_7 = arith.constant dense<0.000000e+00> : vector<64xf32>
    %15 = vector.multi_reduction <add>, %14, %cst_7 [0] : vector<8x64xf32> to vector<64xf32>
    %16 = vector.shape_cast %15 : vector<64xf32> to vector<1x64xf32>
    %cst_8 = arith.constant 8.000000e+00 : f32
    %17 = vector.broadcast %cst_8 : f32 to vector<1x64xf32>
    %18 = arith.divf %16, %17 : vector<1x64xf32>
    %cst_9 = arith.constant 9.99999974E-6 : f32
    %19 = vector.broadcast %cst_9 : f32 to vector<1x64xf32>
    %20 = arith.addf %18, %19 : vector<1x64xf32>
    %21 = math.rsqrt %20 : vector<1x64xf32>
    %22 = vector.broadcast %9 : vector<1x64xf32> to vector<8x64xf32>
    %23 = arith.subf %5, %22 : vector<8x64xf32>
    %24 = vector.broadcast %21 : vector<1x64xf32> to vector<8x64xf32>
    %25 = arith.mulf %23, %24 : vector<8x64xf32>
    %c0_10 = arith.constant 0 : index
    %c0_11 = arith.constant 0 : index
    %26 = vector.load %arg4[%c0_10, %c0_11] : memref<1x64xf32, #tpu.memory_space<vmem>>, vector<1x64xf32>
    %27 = vector.broadcast %26 : vector<1x64xf32> to vector<8x64xf32>
    %28 = arith.mulf %25, %27 : vector<8x64xf32>
    %c0_12 = arith.constant 0 : index
    %c0_13 = arith.constant 0 : index
    %29 = vector.load %arg5[%c0_12, %c0_13] : memref<1x64xf32, #tpu.memory_space<vmem>>, vector<1x64xf32>
    %30 = vector.broadcast %29 : vector<1x64xf32> to vector<8x64xf32>
    %31 = arith.addf %28, %30 : vector<8x64xf32>
    %cst_14 = arith.constant 0.000000e+00 : f32
    %32 = vector.broadcast %cst_14 : f32 to vector<8x64xf32>
    %33 = arith.maximumf %31, %32 : vector<8x64xf32>
    %c0_15 = arith.constant 0 : index
    %c0_16 = arith.constant 0 : index
    %34 = vector.load %arg6[%c0_15, %c0_16] : memref<64x10xf32, #tpu.memory_space<vmem>>, vector<64x10xf32>
    %cst_17 = arith.constant dense<0.000000e+00> : vector<8x10xf32>
    %35 = tpu.matmul %33, %34, %cst_17 {dimension_numbers = #tpu.dot_dimension_numbers<[1], [0], [0], [1], [0, 0, 1, 1], [], []>} : vector<8x64xf32>, vector<64x10xf32>, vector<8x10xf32> -> vector<8x10xf32>
    %c0_18 = arith.constant 0 : index
    %c0_19 = arith.constant 0 : index
    %36 = vector.load %arg7[%c0_18, %c0_19] : memref<1x10xf32, #tpu.memory_space<vmem>>, vector<1x10xf32>
    %37 = vector.broadcast %36 : vector<1x10xf32> to vector<8x10xf32>
    %38 = arith.addf %35, %37 : vector<8x10xf32>
    %c0_20 = arith.constant 0 : index
    %c0_21 = arith.constant 0 : index
    %39 = vector.load %arg8[%c0_20, %c0_21] : memref<8x10xf32, #tpu.memory_space<vmem>>, vector<8x10xf32>
    tpu.vector_store %arg8[%c0_20, %c0_21], %38 {strides = array<i32>} : memref<8x10xf32, #tpu.memory_space<vmem>>, vector<8x10xf32>,
    return
  }
  func.func @transform_0(%arg0: i32) -> (i32, i32) {
    %c0_i32 = arith.constant 0 : i32
    %c0_i32_0 = arith.constant 0 : i32
    %c0_i32_1 = arith.constant 0 : i32
    return %c0_i32, %c0_i32_0 : i32, i32
  }
  func.func @transform_1(%arg0: i32) -> (i32, i32) {
    %c0_i32 = arith.constant 0 : i32
    %c0_i32_0 = arith.constant 0 : i32
    %c0_i32_1 = arith.constant 0 : i32
    return %c0_i32, %c0_i32_0 : i32, i32
  }
  func.func @transform_2(%arg0: i32) -> (i32, i32) {
    %c0_i32 = arith.constant 0 : i32
    %c0_i32_0 = arith.constant 0 : i32
    %c0_i32_1 = arith.constant 0 : i32
    return %c0_i32, %c0_i32_0 : i32, i32
  }
  func.func @transform_3(%arg0: i32) -> (i32, i32) {
    %c0_i32 = arith.constant 0 : i32
    %c0_i32_0 = arith.constant 0 : i32
    %c0_i32_1 = arith.constant 0 : i32
    return %c0_i32, %c0_i32_0 : i32, i32
  }
  func.func @transform_4(%arg0: i32) -> (i32, i32) {
    %c0_i32 = arith.constant 0 : i32
    %c0_i32_0 = arith.constant 0 : i32
    %c0_i32_1 = arith.constant 0 : i32
    return %c0_i32, %c0_i32_0 : i32, i32
  }
  func.func @transform_5(%arg0: i32) -> (i32, i32) {
    %c0_i32 = arith.constant 0 : i32
    %c0_i32_0 = arith.constant 0 : i32
    %c0_i32_1 = arith.constant 0 : i32
    return %c0_i32, %c0_i32_0 : i32, i32
  }
  func.func @transform_6(%arg0: i32) -> (i32, i32) {
    %c0_i32 = arith.constant 0 : i32
    %c0_i32_0 = arith.constant 0 : i32
    %c0_i32_1 = arith.constant 0 : i32
    return %c0_i32, %c0_i32_0 : i32, i32
  }
  func.func @transform_7(%arg0: i32) -> (i32, i32) {
    %c0_i32 = arith.constant 0 : i32
    %c0_i32_0 = arith.constant 0 : i32
    %c0_i32_1 = arith.constant 0 : i32
    return %c0_i32, %c0_i32_0 : i32, i32
  }
}

</mosaic_0001>

<bundles_post_ra>
// kernel: tpu_custom_call.1
= control target key start
LH: loop header
LB: loop body
LE: loop exit
PB: predicated region body
PF: predicated region fallthrough
CT: control target
= control target key end

     0   :  { %vm46_vm0 = vcmask 1040384   ;;  %v351_v1 = vmov 0.0   ;;  %vm352_vm1 = vmmov 0   ;;  %s460_s0 = inlined_call_operand.vmem [shape: f32[8,49], index: 0, kind: input, shape index: {}]   ;;  %s461_s1 = inlined_call_operand.vmem [shape: f32[49,64], index: 1, kind: input, shape index: {}]   ;;  %s462_s2 = inlined_call_operand.vmem [shape: f32[1,64], index: 2, kind: input, shape index: {}]   ;;  %s463_s3 = inlined_call_operand.vmem [shape: f32[1,64], index: 3, kind: input, shape index: {}]   ;;  %s464_s4 = inlined_call_operand.vmem [shape: f32[1,64], index: 4, kind: input, shape index: {}]   ;;  %s465_s5 = inlined_call_operand.vmem [shape: f32[64,10], index: 5, kind: input, shape index: {}]   ;;  %s466_s6 = inlined_call_operand.vmem [shape: f32[1,10], index: 6, kind: input, shape index: {}]   ;;  %s467_s7 = inlined_call_operand.hbm [shape: f32[8,10], index: 7, kind: output, shape index: {}]  }
   0x1   :  { %v34_v0 = vld [vmem:[%s461_s1 + $0x30] sm:$0x1]  ;;  %288 = vmatprep.subr.mxu0 %v351_v1  ;;  %v33_v2 = vld [vmem:[%s461_s1 + $0x28] sm:$0xff]  ;;  %305 = vmatprep.subr.mxu1 %v351_v1  ;;  %v32_v3 = vld [vmem:[%s461_s1 + $0x20] sm:$0xff] }
   0x2   :  { %289 = vmatpush3.msk.msra.mxu0 %vm46_vm0, %v34_v0  ;;  %302 = vmatprep.mubr.msk.f32.mxu0 %vm352_vm1, %v351_v1 }
   0x3   :  { %290 = vmatprep.subr.mxu0 %v351_v1  ;;  %321 = vmatprep.mubr.msk.f32.mxu1 %vm352_vm1, %v351_v1 }
   0x4   :  { %12 = vsyncpa [#allocation3], 0  ;;  %291 = vmatpush3.msra.mxu0 %v33_v2  ;;  %v31_v4 = vld [vmem:[%s461_s1 + $0x18] sm:$0xff]  ;;  %v30_v5 = vld [vmem:[%s461_s1 + $0x10] sm:$0xff]  ;;  %vm42_vm2 = vcmask 400384   ;;  %vm120_vm3 = vcmask 523264  }
   0x5   :  { %292 = vmatprep.subr.mxu0 %v351_v1  ;;  %v29_v6 = vld [vmem:[%s461_s1 + $0x8] sm:$0xff]  ;;  %v28_v7 = vld [vmem:[%s461_s1] sm:$0xff]  ;;  %v167_v9 = vld [vmem:[%s465_s5 + $0x38] sm:$0xff]  ;;  %s353_s14 = smov [#allocation2]   ;;  %vm248_vm4 = vcmask 80896  }
   0x6   :  { %293 = vmatpush3.msra.mxu0 %v32_v3  ;;  %v27_v8 = vld [vmem:[%s460_s0] sm:$0xff]  ;;  %306 = vmatpush3.msra.mxu1 %v167_v9  ;;  %v166_v10 = vld [vmem:[%s465_s5 + $0x30] sm:$0xff]  ;;  %v165_v11 = vld [vmem:[%s465_s5 + $0x28] sm:$0xff]  ;;  %s256_s15 = sshll.u32 %s353_s14, 4  ;;  %s257_s15 = int_to_ptr.vmem [resolvable:$true] %s256_s15 }
   0x7   :  { %294 = vmatprep.subr.mxu0 %v351_v1  ;;  %307 = vmatprep.subr.mxu1 %v351_v1  ;;  %v164_v12 = vld [vmem:[%s465_s5 + $0x20] sm:$0xff]  ;;  %v163_v13 = vld [vmem:[%s465_s5 + $0x18] sm:$0xff]  ;;  %v162_v14 = vld [vmem:[%s465_s5 + $0x10] sm:$0xff]  ;;  %p334_p1 = scmp.lt.s32.totalorder %s257_s15, %s257_s15 }
   0x8   :  { %295 = vmatpush3.msra.mxu0 %v31_v4  ;;  %308 = vmatpush3.msra.mxu1 %v166_v10  ;;  %v161_v15 = vld [vmem:[%s465_s5 + $0x8] sm:$0xff]  ;;  %v160_v16 = vld [vmem:[%s465_s5] sm:$0xff] }
   0x9   :  { %296 = vmatprep.subr.mxu0 %v351_v1  ;;  %309 = vmatprep.subr.mxu1 %v351_v1  ;;  %v264_v17 = vld [vmem:[%s462_s2] ss:$0 sm:$0xff] }
   0xa   :  { %297 = vmatpush3.msra.mxu0 %v30_v5  ;;  %310 = vmatpush3.msra.mxu1 %v165_v11  ;;  %v267_v41 = vld [vmem:[%s463_s3] ss:$0 sm:$0xff]  ;;  %s329_s3 = scalar_lea.vmem %s257_s15, 128 }
   0xb   :  { %298 = vmatprep.subr.mxu0 %v351_v1  ;;  %311 = vmatprep.subr.mxu1 %v351_v1  ;;  %v268_v43 = vld [vmem:[%s464_s4] ss:$0 sm:$0xff]  ;;  %p330_p0 = scmp.ne.s32.totalorder %s257_s15, %s329_s3  ;;  %p335_p2 = scmp.lt.s32.totalorder %s329_s3, %s329_s3 }
   0xc   :  { %299 = vmatpush3.msra.mxu0 %v29_v6  ;;  %312 = vmatpush3.msra.mxu1 %v164_v12  ;;  %v269_v47 = vld [vmem:[%s466_s6] ss:$0 sm:$0xff] }
   0xd   :  { %300 = vmatprep.subr.mxu0 %v351_v1  ;;  %313 = vmatprep.subr.mxu1 %v351_v1  ;;  %p336_p3 = por %p335_p2, %p334_p1 }
   0xe   :  { %301 = vmatpush3.msra.mxu0 %v28_v7  ;;  %314 = vmatpush3.msra.mxu1 %v163_v13 }
   0xf   :  { %303 = vmatmul.mubr.msk.f32.vlgmr.msra.gmra.mxu0 %vm42_vm2, %v27_v8  ;;  %315 = vmatprep.subr.mxu1 %v351_v1  ;;  %p337_p4 = pnand %p336_p3, %p330_p0 }
  0x10   :  { %316 = vmatpush3.msra.mxu1 %v162_v14 }
  0x11   :  { %317 = vmatprep.subr.mxu1 %v351_v1 }
  0x12   :  { %318 = vmatpush3.msra.mxu1 %v161_v15 }
  0x13   :  { %319 = vmatprep.subr.mxu1 %v351_v1 }
  0x14   :  { %320 = vmatpush3.msra.mxu1 %v160_v16 }
  0xcf   :  { %v116_v18 = vpop.f32.mrf.mxu0 }
  0xd0   :  { %v117_v19 = vadd.f32 %v264_v17, %v116_v18 }
  0xd1   :  { %v304_v20 = vpop.f32.mrf.mxu0 }
  0xd2   :  { %v121_v21 = vsel %vm120_vm3, %v117_v19, 0.0 }
  0xd3   :  { %v122_v22 = vrot.slane %v121_v21, 4 }
  0xd5   :  { %v123_v23 = vadd.f32 %v122_v22, %v121_v21 }
  0xd7   :  { %v124_v24 = vrot.slane %v123_v23, 2 }
  0xd9   :  { %v125_v25 = vadd.f32 %v124_v24, %v123_v23 }
  0xdb   :  { %v126_v26 = vrot.slane %v125_v25, 1 }
  0xdd   :  { %v127_v27 = vadd.f32 %v126_v26, %v125_v25 }
  0xdf   :  { %v129_v28 = vmul.f32 0.125, %v127_v27 }
  0xe1   :  { %v130_v29 = vsub.f32 %v117_v19, %v129_v28 }
  0xe3   :  { %v131_v30 = vmul.f32 %v130_v29, %v130_v29 }
  0xe5   :  { %v132_v31 = vsel %vm120_vm3, %v131_v30, 0.0 }
  0xe6   :  { %v133_v32 = vrot.slane %v132_v31, 4 }
  0xe8   :  { %v134_v33 = vadd.f32 %v133_v32, %v132_v31 }
  0xea   :  { %v135_v34 = vrot.slane %v134_v33, 2 }
  0xec   :  { %v136_v35 = vadd.f32 %v135_v34, %v134_v33 }
  0xee   :  { %v137_v36 = vrot.slane %v136_v35, 1 }
  0xf0   :  { %v138_v37 = vadd.f32 %v137_v36, %v136_v35 }
  0xf2   :  { %v139_v38 = vmul.f32 0.125, %v138_v37 }
  0xf4   :  { %v140_v39 = vadd.f32 1e-05, %v139_v38 }
  0xf6   :  { %327 = vrsqrt.f32 %v140_v39 }
 0x103   :  { %v328_v40 = vpop.eup %327 }
 0x104   :  { %v142_v42 = vmul.f32 %v328_v40, %v130_v29 }
 0x106   :  { %v150_v44 = vmul.f32 %v267_v41, %v142_v42 }
 0x108   :  { %v158_v45 = vadd.f32 %v268_v43, %v150_v44 }
 0x10a   :  { %v159_v46 = vmax.f32 %v158_v45, 0.0 }
 0x10c   :  { %322 = vmatmul.mubr.msk.f32.vlgmr.msra.gmra.mxu1 %vm120_vm3, %v159_v46 }
 0x1cc   :  { %v244_v48 = vpop.f32.mrf.mxu1 }
 0x1cd   :  { %v245_v49 = vadd.f32 %v269_v47, %v244_v48 }
 0x1ce   :  { %v323_v50 = vpop.f32.mrf.mxu1 }
 0x1cf   :  { %249 = vst.msk [vmem:[#allocation2] sm:$0xff] %vm248_vm4, %v245_v49 }
 0x1d0   :  { %340 = shalt.err (!%p337_p4)
}
 0x1d1   :  { %259 = dma.vmem_to_hbm [thread:$0]  %s257_s15, 128, %s467_s7, [#allocation3]  }
 0x1d2   :  { %349 = dma.done.wait [#allocation3], 128  }
 0x1d3   :  { %350 = vsyncadd [#allocation3], 4294967168 }
 0x1d4   :  { %263 = vsyncpa [#allocation3], 1 }

</bundles_post_ra>
